<compile_context>
chip_gen: v6e
topology: v6e:2x2x1
jax: 0.10.0
libtpu: 0.0.40
codegen_flags: <defaults>
</compile_context>

<pallas_src>
import functools
import math

import jax
import jax.numpy as jnp
from jax import lax
from jax.experimental import pallas as pl
from jax.experimental.pallas import tpu as pltpu

LN_EPS = 1e-5


def _round_up(n, m):
    return ((n + m - 1) // m) * m


def _cdiv(a, b):
    return (a + b - 1) // b


def _pad2d(a, rows, cols):
    r, c = a.shape
    if r == rows and c == cols:
        return a
    return jnp.pad(a, ((0, rows - r), (0, cols - c)))


def _vmem_limit_bytes():
    """VMEM budget with headroom: ~48 MiB on v7x (64 MiB parts), ~100 MiB on v5e/v6e."""
    try:
        cap = pltpu.get_tpu_info().vmem_capacity_bytes
    except Exception:
        cap = 128 * 1024 * 1024
    return int(min(cap - 16 * 1024 * 1024, 100 * 1024 * 1024))


def _fc_kernel(x_ref, w1_ref, p1_ref, w2_ref, b2_ref, o_ref, *scratch,
               hidden, mxu_bf16, gelu_tanh, tiled_n):
    def compute_h():
        # ---- dense1: x @ W1 + b1 (MXU, f32 accumulation) ----
        h = jnp.dot(x_ref[...], w1_ref[...], preferred_element_type=jnp.float32)
        p = p1_ref[...]                      # (3, Hp): rows = [b1, gamma, beta]
        h = h + p[0:1, :]

        # ---- dropout (inference mode => identity) ----
        # TODO(synk): training-mode dropout would use pltpu.prng_seed/prng_random_bits.

        # ---- GELU ----
        if gelu_tanh:
            c = math.sqrt(2.0 / math.pi)
            h = 0.5 * h * (1.0 + jnp.tanh(c * (h + 0.044715 * h * h * h)))
        else:
            # exact erf form (torch.nn.GELU default)
            h = 0.5 * h * (1.0 + lax.erf(h * (1.0 / math.sqrt(2.0))))

        # ---- LayerNorm over the *true* hidden columns (one-pass sums) ----
        # Padded hidden columns are exactly zero (zero-padded W1 cols, b1, GELU(0)=0),
        # so sum(h) and sum(h*h) over the padded axis are already correct.  Padded
        # gamma/beta are zero, so padded outputs stay zero.
        inv_h = 1.0 / hidden
        s = jnp.sum(h, axis=-1, keepdims=True)
        s2 = jnp.sum(h * h, axis=-1, keepdims=True)
        mean = s * inv_h
        var = jnp.maximum(s2 * inv_h - mean * mean, 0.0)
        inv_std = lax.rsqrt(var + LN_EPS)
        return (h - mean) * (inv_std * p[1:2, :]) + p[2:3, :]

    if tiled_n:
        # h is reused across all output-column tiles: compute once per row tile.
        h_scr = scratch[0]

        @pl.when(pl.program_id(1) == 0)
        def _():
            h_scr[...] = compute_h().astype(h_scr.dtype)

        h = h_scr[...]
    else:
        h = compute_h()
        if mxu_bf16:
            h = h.astype(jnp.bfloat16)

    # ---- dense: h @ W2 + b2 (MXU, f32 accumulation) ----
    out = jnp.dot(h, w2_ref[...], preferred_element_type=jnp.float32)
    out = out + b2_ref[...]
    o_ref[...] = out.astype(o_ref.dtype)


@functools.partial(jax.jit,
                   static_argnames=("tm", "tn", "mxu_bf16", "gelu_tanh",
                                    "min_row_tiles"))
def fully_connected_layer(x, w1, b1, gamma, beta, w2, b2, *, tm=256, tn=None,
                          mxu_bf16=False, gelu_tanh=False, min_row_tiles=1):
    """x: [batch, seq, input_dim] -> [batch, seq, output_dim].

    tm:            max row tile (balanced-split so padding waste stays small).
    tn:            force output-column tile (None = auto: resident weights if they
                   fit ~60% of the VMEM budget, otherwise tile N at 512).
    mxu_bf16:      cast matmul operands (x, W1, W2, LN output) to bf16 in the wrapper
                   for v5e/v6e/v7x MXU throughput; accumulation + LN stats stay f32.
    gelu_tanh:     use tanh-approximate GELU (EUP) instead of exact erf.
    min_row_tiles: set to 2 on v7x for small M so both TensorCores get work.
    """
    orig_dtype = x.dtype
    batch, seq, d_in = x.shape
    hidden = w1.shape[1]
    d_out = w2.shape[1]
    M = batch * seq

    # ---- lane padding (multiples of 128) ----
    d_in_p = _round_up(d_in, 128)
    hid_p = _round_up(hidden, 128)
    d_out_p = _round_up(d_out, 128)

    # ---- balanced row tiling (minimize row-padding waste) ----
    tm_cap = max(8, min(tm, _round_up(M, 8)))
    num_row_tiles = max(min_row_tiles, _cdiv(M, tm_cap))
    tm_eff = _round_up(_cdiv(M, num_row_tiles), 8)
    m_p = tm_eff * num_row_tiles

    # ---- dtypes for MXU operands ----
    op_dtype = jnp.bfloat16 if mxu_bf16 else jnp.float32
    op_bytes = jnp.dtype(op_dtype).itemsize

    # ---- decide whether W2 must be tiled along the output dim ----
    vmem_limit = _vmem_limit_bytes()
    weight_bytes = (d_in_p * hid_p + hid_p * d_out_p) * op_bytes
    if tn is not None:
        tn_eff = min(_round_up(tn, 128), d_out_p)
    elif weight_bytes <= int(0.6 * vmem_limit):
        tn_eff = d_out_p                      # both weights resident in VMEM
    else:
        tn_eff = min(512, d_out_p)            # tile W2 / output along N
    d_out_p = _round_up(d_out_p, tn_eff)
    n_tiles = d_out_p // tn_eff
    tiled_n = n_tiles > 1

    # ---- pad + pre-cast operands in the wrapper (no per-step converts in kernel) ----
    x2d = _pad2d(x.reshape(M, d_in), m_p, d_in_p).astype(op_dtype)
    w1_p = _pad2d(w1, d_in_p, hid_p).astype(op_dtype)
    w2_p = _pad2d(w2, hid_p, d_out_p).astype(op_dtype)
    # Pack b1 / gamma / beta into one (3, hid_p) slab -> one DMA, one VMEM block (f32).
    p1 = _pad2d(jnp.stack([b1, gamma, beta], axis=0).astype(jnp.float32), 3, hid_p)
    b2_p = _pad2d(b2.reshape(1, d_out).astype(jnp.float32), 1, d_out_p)

    itemsize = jnp.dtype(orig_dtype).itemsize
    cost = pl.CostEstimate(
        flops=2 * M * (d_in * hidden + hidden * d_out),
        transcendentals=M * hidden,
        bytes_accessed=(M * d_in * op_bytes + M * d_out * itemsize
                        + (d_in * hidden + hidden * d_out) * op_bytes
                        + 3 * hidden * 4 + d_out * 4),
    )

    kernel = functools.partial(_fc_kernel, hidden=hidden, mxu_bf16=mxu_bf16,
                               gelu_tanh=gelu_tanh, tiled_n=tiled_n)

    resident = pl.Buffered(1)  # constant-index blocks: no double buffering needed

    if not tiled_n:
        grid = (num_row_tiles,)
        in_specs = [
            pl.BlockSpec((tm_eff, d_in_p), lambda i: (i, 0)),                       # x row tile
            pl.BlockSpec((d_in_p, hid_p), lambda i: (0, 0), pipeline_mode=resident),  # W1
            pl.BlockSpec((3, hid_p), lambda i: (0, 0), pipeline_mode=resident),       # [b1;g;b]
            pl.BlockSpec((hid_p, d_out_p), lambda i: (0, 0), pipeline_mode=resident), # W2
            pl.BlockSpec((1, d_out_p), lambda i: (0, 0), pipeline_mode=resident),     # b2
        ]
        out_specs = pl.BlockSpec((tm_eff, d_out_p), lambda i: (i, 0))
        scratch_shapes = []
        dim_sem = ("parallel",)
    else:
        grid = (num_row_tiles, n_tiles)
        in_specs = [
            pl.BlockSpec((tm_eff, d_in_p), lambda i, j: (i, 0)),                        # x row tile
            pl.BlockSpec((d_in_p, hid_p), lambda i, j: (0, 0), pipeline_mode=resident),  # W1
            pl.BlockSpec((3, hid_p), lambda i, j: (0, 0), pipeline_mode=resident),       # [b1;g;b]
            pl.BlockSpec((hid_p, tn_eff), lambda i, j: (0, j)),                          # W2 N-tile
            pl.BlockSpec((1, tn_eff), lambda i, j: (0, j)),                              # b2 N-tile
        ]
        out_specs = pl.BlockSpec((tm_eff, tn_eff), lambda i, j: (i, j))
        scratch_shapes = [pltpu.VMEM((tm_eff, hid_p), op_dtype)]  # cached LN output
        dim_sem = ("parallel", "arbitrary")

    out2d = pl.pallas_call(
        kernel,
        out_shape=jax.ShapeDtypeStruct((m_p, d_out_p), orig_dtype),
        grid_spec=pltpu.PrefetchScalarGridSpec(
            num_scalar_prefetch=0,
            grid=grid,
            in_specs=in_specs,
            out_specs=out_specs,
            scratch_shapes=scratch_shapes,
        ),
        compiler_params=pltpu.CompilerParams(
            dimension_semantics=dim_sem,
            vmem_limit_bytes=vmem_limit,
        ),
        cost_estimate=cost,
    )(x2d, w1_p, p1, w2_p, b2_p)

    return out2d[:M, :d_out].reshape(batch, seq, d_out)


def _reference(x, w1, b1, gamma, beta, w2, b2):
    h = x @ w1 + b1
    h = jax.nn.gelu(h, approximate=False)
    mean = jnp.mean(h, axis=-1, keepdims=True)
    var = jnp.mean((h - mean) ** 2, axis=-1, keepdims=True)
    h = (h - mean) / jnp.sqrt(var + LN_EPS) * gamma + beta
    return h @ w2 + b2


def _make_params(key, d_in, hidden, d_out):
    kw1, kb1, kw2, kb2 = jax.random.split(key, 4)
    lim1 = 1.0 / math.sqrt(d_in)
    w1 = jax.random.uniform(kw1, (d_in, hidden), jnp.float32, -lim1, lim1)
    b1 = jax.random.uniform(kb1, (hidden,), jnp.float32, -lim1, lim1)
    lim2 = 1.0 / math.sqrt(hidden)
    w2 = jax.random.uniform(kw2, (hidden, d_out), jnp.float32, -lim2, lim2)
    b2 = jax.random.uniform(kb2, (d_out,), jnp.float32, -lim2, lim2)
    gamma = jnp.ones((hidden,), jnp.float32)
    beta = jnp.zeros((hidden,), jnp.float32)
    return w1, b1, gamma, beta, w2, b2


if __name__ == "__main__":
    key = jax.random.PRNGKey(0)
    k1, k2, k3 = jax.random.split(key, 3)

    # ---- test 1: small shapes, resident-weights path, exact f32 semantics ----
    batch, seq = 2, 8
    input_dim, hidden_size, output_dim = 32, 64, 32
    x = jax.random.normal(k1, (batch, seq, input_dim), dtype=jnp.float32)
    w1, b1, gamma, beta, w2, b2 = _make_params(k2, input_dim, hidden_size, output_dim)
    ref = _reference(x, w1, b1, gamma, beta, w2, b2)

    out = fully_connected_layer(x, w1, b1, gamma, beta, w2, b2)
    out = jax.block_until_ready(out)
    assert out.shape == (batch, seq, output_dim)
    assert jnp.allclose(out, ref, atol=1e-4, rtol=1e-4), "f32 resident path mismatch"

    # bf16 MXU-operand path (wrapper pre-cast): loose tolerance.
    out_bf16 = fully_connected_layer(x, w1, b1, gamma, beta, w2, b2, mxu_bf16=True)
    out_bf16 = jax.block_until_ready(out_bf16)
    assert jnp.allclose(out_bf16, ref, atol=5e-2, rtol=5e-2), "bf16 path mismatch"

    # tanh-approximate GELU perf option: moderate tolerance.
    out_tanh = fully_connected_layer(x, w1, b1, gamma, beta, w2, b2, gelu_tanh=True)
    out_tanh = jax.block_until_ready(out_tanh)
    assert jnp.allclose(out_tanh, ref, atol=2e-2, rtol=2e-2), "tanh-GELU path mismatch"

    # ---- test 2: force the tiled-N fallback (W2 / output split along columns) ----
    d_in2, hid2, d_out2 = 64, 128, 256
    x2 = jax.random.normal(k3, (batch, seq, d_in2), dtype=jnp.float32)
    p2 = _make_params(k2, d_in2, hid2, d_out2)
    ref2 = _reference(x2, *p2)
    out2 = fully_connected_layer(x2, *p2, tn=128)   # d_out_p=256 -> 2 N tiles
    out2 = jax.block_until_ready(out2)
    assert out2.shape == (batch, seq, d_out2)
    assert jnp.allclose(out2, ref2, atol=1e-4, rtol=1e-4), "tiled-N path mismatch"

    print("KERNEL_OK")
</pallas_src>

<mosaic_0001>
module attributes {stable_mosaic.version = 11 : i64} {
  func.func @_fc_kernel(%arg0: i32, %arg1: memref<16x128xf32, #tpu.memory_space<vmem>>, %arg2: memref<128x128xf32, #tpu.memory_space<vmem>>, %arg3: memref<3x128xf32, #tpu.memory_space<vmem>>, %arg4: memref<128x128xf32, #tpu.memory_space<vmem>>, %arg5: memref<1x128xf32, #tpu.memory_space<vmem>>, %arg6: memref<16x128xf32, #tpu.memory_space<vmem>>) attributes {dimension_semantics = [#tpu.dimension_semantics<parallel>], iteration_bounds = array<i64: 1>, scalar_prefetch = 0 : i64, scratch_operands = 0 : i64, tpu.core_type = #tpu.core_type<tc>, window_params = [{transform_indices = @transform_0, window_bounds = array<i64: 16, 128>}, {pipeline_mode = #tpu.pipeline_mode<synchronous>, transform_indices = @transform_1, window_bounds = array<i64: 128, 128>}, {pipeline_mode = #tpu.pipeline_mode<synchronous>, transform_indices = @transform_2, window_bounds = array<i64: 3, 128>}, {pipeline_mode = #tpu.pipeline_mode<synchronous>, transform_indices = @transform_3, window_bounds = array<i64: 128, 128>}, {pipeline_mode = #tpu.pipeline_mode<synchronous>, transform_indices = @transform_4, window_bounds = array<i64: 1, 128>}, {transform_indices = @transform_5, window_bounds = array<i64: 16, 128>}]} {
    %c0 = arith.constant 0 : index
    %c0_0 = arith.constant 0 : index
    %0 = vector.load %arg1[%c0, %c0_0] : memref<16x128xf32, #tpu.memory_space<vmem>>, vector<16x128xf32>
    %c0_1 = arith.constant 0 : index
    %c0_2 = arith.constant 0 : index
    %1 = vector.load %arg2[%c0_1, %c0_2] : memref<128x128xf32, #tpu.memory_space<vmem>>, vector<128x128xf32>
    %cst = arith.constant dense<0.000000e+00> : vector<16x128xf32>
    %2 = tpu.matmul %0, %1, %cst {dimension_numbers = #tpu.dot_dimension_numbers<[1], [0], [0], [1], [0, 0, 1, 1], [], []>} : vector<16x128xf32>, vector<128x128xf32>, vector<16x128xf32> -> vector<16x128xf32>
    %c0_3 = arith.constant 0 : index
    %c0_4 = arith.constant 0 : index
    %3 = vector.load %arg3[%c0_3, %c0_4] : memref<3x128xf32, #tpu.memory_space<vmem>>, vector<3x128xf32>
    %4 = vector.extract_strided_slice %3 {offsets = [0, 0], sizes = [1, 128], strides = [1, 1]} : vector<3x128xf32> to vector<1x128xf32>
    %5 = vector.broadcast %4 : vector<1x128xf32> to vector<16x128xf32>
    %6 = arith.addf %2, %5 : vector<16x128xf32>
    %cst_5 = arith.constant 5.000000e-01 : f32
    %7 = vector.broadcast %cst_5 : f32 to vector<16x128xf32>
    %8 = arith.mulf %7, %6 : vector<16x128xf32>
    %cst_6 = arith.constant 0.707106769 : f32
    %9 = vector.broadcast %cst_6 : f32 to vector<16x128xf32>
    %10 = arith.mulf %6, %9 : vector<16x128xf32>
    %11 = math.erf %10 : vector<16x128xf32>
    %cst_7 = arith.constant 1.000000e+00 : f32
    %12 = vector.broadcast %cst_7 : f32 to vector<16x128xf32>
    %13 = arith.addf %12, %11 : vector<16x128xf32>
    %14 = arith.mulf %8, %13 : vector<16x128xf32>
    %cst_8 = arith.constant dense<0.000000e+00> : vector<16xf32>
    %15 = vector.multi_reduction <add>, %14, %cst_8 [1] : vector<16x128xf32> to vector<16xf32>
    %16 = vector.shape_cast %15 : vector<16xf32> to vector<16x1xf32>
    %17 = arith.mulf %14, %14 : vector<16x128xf32>
    %cst_9 = arith.constant dense<0.000000e+00> : vector<16xf32>
    %18 = vector.multi_reduction <add>, %17, %cst_9 [1] : vector<16x128xf32> to vector<16xf32>
    %19 = vector.shape_cast %18 : vector<16xf32> to vector<16x1xf32>
    %cst_10 = arith.constant 1.562500e-02 : f32
    %20 = vector.broadcast %cst_10 : f32 to vector<16x1xf32>
    %21 = arith.mulf %16, %20 : vector<16x1xf32>
    %cst_11 = arith.constant 1.562500e-02 : f32
    %22 = vector.broadcast %cst_11 : f32 to vector<16x1xf32>
    %23 = arith.mulf %19, %22 : vector<16x1xf32>
    %24 = arith.mulf %21, %21 : vector<16x1xf32>
    %25 = arith.subf %23, %24 : vector<16x1xf32>
    %cst_12 = arith.constant 0.000000e+00 : f32
    %26 = vector.broadcast %cst_12 : f32 to vector<16x1xf32>
    %27 = arith.maximumf %25, %26 : vector<16x1xf32>
    %cst_13 = arith.constant 9.99999974E-6 : f32
    %28 = vector.broadcast %cst_13 : f32 to vector<16x1xf32>
    %29 = arith.addf %27, %28 : vector<16x1xf32>
    %30 = math.rsqrt %29 : vector<16x1xf32>
    %31 = vector.broadcast %21 : vector<16x1xf32> to vector<16x128xf32>
    %32 = arith.subf %14, %31 : vector<16x128xf32>
    %33 = vector.extract_strided_slice %3 {offsets = [1, 0], sizes = [1, 128], strides = [1, 1]} : vector<3x128xf32> to vector<1x128xf32>
    %34 = vector.broadcast %30 : vector<16x1xf32> to vector<16x128xf32>
    %35 = vector.broadcast %33 : vector<1x128xf32> to vector<16x128xf32>
    %36 = arith.mulf %34, %35 : vector<16x128xf32>
    %37 = arith.mulf %32, %36 : vector<16x128xf32>
    %38 = vector.extract_strided_slice %3 {offsets = [2, 0], sizes = [1, 128], strides = [1, 1]} : vector<3x128xf32> to vector<1x128xf32>
    %39 = vector.broadcast %38 : vector<1x128xf32> to vector<16x128xf32>
    %40 = arith.addf %37, %39 : vector<16x128xf32>
    %c0_14 = arith.constant 0 : index
    %c0_15 = arith.constant 0 : index
    %41 = vector.load %arg4[%c0_14, %c0_15] : memref<128x128xf32, #tpu.memory_space<vmem>>, vector<128x128xf32>
    %cst_16 = arith.constant dense<0.000000e+00> : vector<16x128xf32>
    %42 = tpu.matmul %40, %41, %cst_16 {dimension_numbers = #tpu.dot_dimension_numbers<[1], [0], [0], [1], [0, 0, 1, 1], [], []>} : vector<16x128xf32>, vector<128x128xf32>, vector<16x128xf32> -> vector<16x128xf32>
    %c0_17 = arith.constant 0 : index
    %c0_18 = arith.constant 0 : index
    %43 = vector.load %arg5[%c0_17, %c0_18] : memref<1x128xf32, #tpu.memory_space<vmem>>, vector<1x128xf32>
    %44 = vector.broadcast %43 : vector<1x128xf32> to vector<16x128xf32>
    %45 = arith.addf %42, %44 : vector<16x128xf32>
    %c0_19 = arith.constant 0 : index
    %c0_20 = arith.constant 0 : index
    %46 = vector.load %arg6[%c0_19, %c0_20] : memref<16x128xf32, #tpu.memory_space<vmem>>, vector<16x128xf32>
    tpu.vector_store %arg6[%c0_19, %c0_20], %45 {strides = array<i32>} : memref<16x128xf32, #tpu.memory_space<vmem>>, vector<16x128xf32>,
    return
  }
  func.func @transform_0(%arg0: i32) -> (i32, i32) {
    %c0_i32 = arith.constant 0 : i32
    %c0_i32_0 = arith.constant 0 : i32
    return %arg0, %c0_i32 : i32, i32
  }
  func.func @transform_1(%arg0: i32) -> (i32, i32) {
    %c0_i32 = arith.constant 0 : i32
    %c0_i32_0 = arith.constant 0 : i32
    %c0_i32_1 = arith.constant 0 : i32
    return %c0_i32, %c0_i32_0 : i32, i32
  }
  func.func @transform_2(%arg0: i32) -> (i32, i32) {
    %c0_i32 = arith.constant 0 : i32
    %c0_i32_0 = arith.constant 0 : i32
    %c0_i32_1 = arith.constant 0 : i32
    return %c0_i32, %c0_i32_0 : i32, i32
  }
  func.func @transform_3(%arg0: i32) -> (i32, i32) {
    %c0_i32 = arith.constant 0 : i32
    %c0_i32_0 = arith.constant 0 : i32
    %c0_i32_1 = arith.constant 0 : i32
    return %c0_i32, %c0_i32_0 : i32, i32
  }
  func.func @transform_4(%arg0: i32) -> (i32, i32) {
    %c0_i32 = arith.constant 0 : i32
    %c0_i32_0 = arith.constant 0 : i32
    %c0_i32_1 = arith.constant 0 : i32
    return %c0_i32, %c0_i32_0 : i32, i32
  }
  func.func @transform_5(%arg0: i32) -> (i32, i32) {
    %c0_i32 = arith.constant 0 : i32
    %c0_i32_0 = arith.constant 0 : i32
    return %arg0, %c0_i32 : i32, i32
  }
}

</mosaic_0001>

<bundles_post_ra>
// kernel: fully_connected_layer.1
= control target key start
LH: loop header
LB: loop body
LE: loop exit
PB: predicated region body
PF: predicated region fallthrough
CT: control target
= control target key end

     0   :  { %v39_v18 = vlaneseq  ;;  %s553_s1 = inlined_call_operand.vmem [shape: f32[128,128], index: 1, kind: input, shape index: {}]   ;;  %s554_s0 = inlined_call_operand.vmem [shape: f32[16,128], index: 0, kind: input, shape index: {}]   ;;  %s555_s2 = inlined_call_operand.vmem [shape: f32[3,128], index: 2, kind: input, shape index: {}]   ;;  %s556_s3 = inlined_call_operand.vmem [shape: f32[128,128], index: 3, kind: input, shape index: {}]   ;;  %s557_s4 = inlined_call_operand.vmem [shape: f32[1,128], index: 4, kind: input, shape index: {}]   ;;  %s558_s5 = inlined_call_operand.vmem [shape: f32[16,128], index: 5, kind: output, shape index: {}]  }
   0x1   :  { %v37_v0 = vld [vmem:[%s553_s1 + $0x78] sm:$0xff]  ;;  %v36_v1 = vld [vmem:[%s553_s1 + $0x70] sm:$0xff]  ;;  %v35_v2 = vld [vmem:[%s553_s1 + $0x68] sm:$0xff] }
   0x2   :  { %309 = vmatprep.subr.mxu0 %v37_v0  ;;  %v34_v3 = vld [vmem:[%s553_s1 + $0x60] sm:$0xff]  ;;  %v33_v5 = vld [vmem:[%s553_s1 + $0x58] sm:$0xff]  ;;  %v32_v6 = vld [vmem:[%s553_s1 + $0x50] sm:$0xff]  ;;  %v471_v19 = vshrl.u32 %v39_v18, 7 }
   0x3   :  { %310 = vmatpush3.msra.mxu0 %v37_v0  ;;  %v20_v4 = vld [vmem:[%s554_s0] sm:$0xff]  ;;  %v31_v7 = vld [vmem:[%s553_s1 + $0x48] sm:$0xff]  ;;  %v29_v9 = vld [vmem:[%s553_s1 + $0x38] sm:$0xff] }
   0x4   :  { %311 = vmatprep.subr.mxu0 %v36_v1  ;;  %341 = vmatprep.mubr.f32.mxu0 %v20_v4  ;;  %v30_v8 = vld [vmem:[%s553_s1 + $0x40] sm:$0xff]  ;;  %v28_v10 = vld [vmem:[%s553_s1 + $0x30] sm:$0xff]  ;;  %v27_v11 = vld [vmem:[%s553_s1 + $0x28] sm:$0xff]  ;;  %v41_v20 = vsub.s32 0, %v471_v19 }
   0x5   :  { %312 = vmatpush3.msra.mxu0 %v36_v1  ;;  %v26_v12 = vld [vmem:[%s553_s1 + $0x20] sm:$0xff]  ;;  %v25_v13 = vld [vmem:[%s553_s1 + $0x18] sm:$0xff]  ;;  %v24_v14 = vld [vmem:[%s553_s1 + $0x10] sm:$0xff] }
   0x6   :  { %313 = vmatprep.subr.mxu0 %v35_v2  ;;  %v23_v15 = vld [vmem:[%s553_s1 + $0x8] sm:$0xff]  ;;  %v22_v16 = vld [vmem:[%s553_s1] sm:$0xff]  ;;  %v183_v39 = vld [vmem:[%s556_s3 + $0x78] sm:$0xff] }
   0x7   :  { %314 = vmatpush3.msra.mxu0 %v35_v2  ;;  %v21_v17 = vld [vmem:[%s554_s0 + $0x8] sm:$0xff]  ;;  %v477_v21 = vld [vmem:[%s555_s2] sm:$0x7]  ;;  %344 = vmatprep.subr.mxu1 %v183_v39  ;;  %v182_v40 = vld [vmem:[%s556_s3 + $0x70] sm:$0xff] }
   0x8   :  { %315 = vmatprep.subr.mxu0 %v34_v3  ;;  %v42_v22 = vrot.slane %v477_v21, %v41_v20  ;;  %345 = vmatpush3.msra.mxu1 %v183_v39  ;;  %v181_v41 = vld [vmem:[%s556_s3 + $0x68] sm:$0xff]  ;;  %v180_v42 = vld [vmem:[%s556_s3 + $0x60] sm:$0xff]  ;;  %v179_v43 = vld [vmem:[%s556_s3 + $0x58] sm:$0xff] }
   0x9   :  { %316 = vmatpush3.msra.mxu0 %v34_v3  ;;  %346 = vmatprep.subr.mxu1 %v182_v40  ;;  %v178_v44 = vld [vmem:[%s556_s3 + $0x50] sm:$0xff]  ;;  %v177_v45 = vld [vmem:[%s556_s3 + $0x48] sm:$0xff]  ;;  %v176_v46 = vld [vmem:[%s556_s3 + $0x40] sm:$0xff] }
   0xa   :  { %317 = vmatprep.subr.mxu0 %v33_v5  ;;  %347 = vmatpush3.msra.mxu1 %v182_v40  ;;  %v175_v47 = vld [vmem:[%s556_s3 + $0x38] sm:$0xff]  ;;  %v174_v48 = vld [vmem:[%s556_s3 + $0x30] sm:$0xff]  ;;  %v173_v49 = vld [vmem:[%s556_s3 + $0x28] sm:$0xff] }
   0xb   :  { %318 = vmatpush3.msra.mxu0 %v33_v5  ;;  %348 = vmatprep.subr.mxu1 %v181_v41  ;;  %v172_v50 = vld [vmem:[%s556_s3 + $0x20] sm:$0xff]  ;;  %v171_v51 = vld [vmem:[%s556_s3 + $0x18] sm:$0xff]  ;;  %v170_v52 = vld [vmem:[%s556_s3 + $0x10] sm:$0xff] }
   0xc   :  { %319 = vmatprep.subr.mxu0 %v32_v6  ;;  %349 = vmatpush3.msra.mxu1 %v181_v41  ;;  %v169_v53 = vld [vmem:[%s556_s3 + $0x8] sm:$0xff]  ;;  %v168_v54 = vld [vmem:[%s556_s3] sm:$0xff] }
   0xd   :  { %320 = vmatpush3.msra.mxu0 %v32_v6  ;;  %350 = vmatprep.subr.mxu1 %v180_v42 }
   0xe   :  { %321 = vmatprep.subr.mxu0 %v31_v7  ;;  %351 = vmatpush3.msra.mxu1 %v180_v42 }
   0xf   :  { %322 = vmatpush3.msra.mxu0 %v31_v7  ;;  %352 = vmatprep.subr.mxu1 %v179_v43  ;;  %v156_v7 = vsub.s32 1, %v471_v19 }
  0x10   :  { %323 = vmatprep.subr.mxu0 %v30_v8  ;;  %353 = vmatpush3.msra.mxu1 %v179_v43 }
  0x11   :  { %324 = vmatpush3.msra.mxu0 %v30_v8  ;;  %354 = vmatprep.subr.mxu1 %v178_v44  ;;  %v157_v8 = vrot.slane %v477_v21, %v156_v7 }
  0x12   :  { %325 = vmatprep.subr.mxu0 %v29_v9  ;;  %355 = vmatpush3.msra.mxu1 %v178_v44 }
  0x13   :  { %326 = vmatpush3.msra.mxu0 %v29_v9  ;;  %356 = vmatprep.subr.mxu1 %v177_v45  ;;  %v164_v9 = vsub.s32 2, %v471_v19  ;;  %v272_v19 = vld [vmem:[%s557_s4] ss:$0 sm:$0xff] }
  0x14   :  { %327 = vmatprep.subr.mxu0 %v28_v10  ;;  %357 = vmatpush3.msra.mxu1 %v177_v45 }
  0x15   :  { %328 = vmatpush3.msra.mxu0 %v28_v10  ;;  %358 = vmatprep.subr.mxu1 %v176_v46 }
  0x16   :  { %329 = vmatprep.subr.mxu0 %v27_v11  ;;  %359 = vmatpush3.msra.mxu1 %v176_v46 }
  0x17   :  { %330 = vmatpush3.msra.mxu0 %v27_v11  ;;  %360 = vmatprep.subr.mxu1 %v175_v47 }
  0x18   :  { %331 = vmatprep.subr.mxu0 %v26_v12  ;;  %361 = vmatpush3.msra.mxu1 %v175_v47 }
  0x19   :  { %332 = vmatpush3.msra.mxu0 %v26_v12  ;;  %362 = vmatprep.subr.mxu1 %v174_v48 }
  0x1a   :  { %333 = vmatprep.subr.mxu0 %v25_v13  ;;  %363 = vmatpush3.msra.mxu1 %v174_v48 }
  0x1b   :  { %334 = vmatpush3.msra.mxu0 %v25_v13  ;;  %364 = vmatprep.subr.mxu1 %v173_v49  ;;  %v165_v13 = vrot.slane %v477_v21, %v164_v9 }
  0x1c   :  { %335 = vmatprep.subr.mxu0 %v24_v14  ;;  %365 = vmatpush3.msra.mxu1 %v173_v49 }
  0x1d   :  { %336 = vmatpush3.msra.mxu0 %v24_v14  ;;  %366 = vmatprep.subr.mxu1 %v172_v50 }
  0x1e   :  { %337 = vmatprep.subr.mxu0 %v23_v15  ;;  %367 = vmatpush3.msra.mxu1 %v172_v50 }
  0x1f   :  { %338 = vmatpush3.msra.mxu0 %v23_v15  ;;  %368 = vmatprep.subr.mxu1 %v171_v51 }
  0x20   :  { %339 = vmatprep.subr.mxu0 %v22_v16  ;;  %369 = vmatpush3.msra.mxu1 %v171_v51 }
  0x21   :  { %340 = vmatpush3.msra.mxu0 %v22_v16  ;;  %370 = vmatprep.subr.mxu1 %v170_v52 }
  0x22   :  { %342 = vmatmul.mubr.f32.vlgmr.msra.gmra.mxu0 %v21_v17  ;;  %371 = vmatpush3.msra.mxu1 %v170_v52 }
  0x23   :  { %372 = vmatprep.subr.mxu1 %v169_v53 }
  0x24   :  { %373 = vmatpush3.msra.mxu1 %v169_v53 }
  0x25   :  { %374 = vmatprep.subr.mxu1 %v168_v54 }
  0x26   :  { %375 = vmatpush3.msra.mxu1 %v168_v54 }
  0xe2   :  { %v343_v23 = vpop.f32.mrf.mxu0 }
  0xe3   :  { %v115_v24 = vadd.f32 %v343_v23, %v42_v22 }
  0xe4   :  { %v109_v25 = vpop.f32.mrf.mxu0 }
  0xe5   :  { %v121_v26 = vmul.f32 0.70710677, %v115_v24  ;;  %v110_v27 = vadd.f32 %v109_v25, %v42_v22  ;;  %v119_v34 = vmul.f32 0.5, %v115_v24 }
  0xe7   :  { %379 = verf.f32 %v121_v26  ;;  %v120_v28 = vmul.f32 0.70710677, %v110_v27  ;;  %v118_v31 = vmul.f32 0.5, %v110_v27 }
  0xe9   :  { %381 = verf.f32 %v120_v28 }
  0xf4   :  { %v380_v29 = vpop.eup %379 }
  0xf5   :  { %v125_v33 = vadd.f32 1.0, %v380_v29 }
  0xf6   :  { %v382_v30 = vpop.eup %381 }
  0xf7   :  { %v124_v32 = vadd.f32 1.0, %v382_v30  ;;  %v485_v37 = vmul.f32 %v125_v33, %v119_v34 }
  0xf9   :  { %v480_v35 = vmul.f32 %v124_v32, %v118_v31  ;;  %v133_v38 = vmul.f32 %v485_v37, %v485_v37 }
  0xfb   :  { %128 = vadd.xlane.f32.xlu0 %v480_v35  ;;  %v132_v36 = vmul.f32 %v480_v35, %v480_v35 }
  0xfd   :  { %134 = vadd.xlane.f32.xlu1 %v132_v36 }
  0xff   :  { %130 = vadd.xlane.f32.xlu0 %v485_v37 }
 0x101   :  { %136 = vadd.xlane.f32.xlu1 %v133_v38 }
 0x184   :  { %v129_v55 = vpop.xlane.xlu0 %128 }
 0x185   :  { %v138_v56 = vmul.f32 0.015625, %v129_v55 }
 0x186   :  { %v135_v57 = vpop.xlane.xlu1 %134 }
 0x187   :  { %v142_v58 = vmul.f32 %v138_v56, %v138_v56  ;;  %v140_v59 = vmul.f32 0.015625, %v135_v57  ;;  %v152_v11 = vsub.f32 %v480_v35, %v138_v56 }
 0x188   :  { %v131_v60 = vpop.xlane.xlu0 %130 }
 0x189   :  { %v144_v61 = vsub.f32 %v140_v59, %v142_v58  ;;  %v139_v62 = vmul.f32 0.015625, %v131_v60 }
 0x18a   :  { %v137_v63 = vpop.xlane.xlu1 %136 }
 0x18b   :  { %v146_v0 = vmax.f32 %v144_v61, 0.0  ;;  %v143_v1 = vmul.f32 %v139_v62, %v139_v62  ;;  %v141_v2 = vmul.f32 0.015625, %v137_v63  ;;  %v153_v16 = vsub.f32 %v485_v37, %v139_v62 }
 0x18d   :  { %v148_v3 = vadd.f32 1e-05, %v146_v0  ;;  %v145_v4 = vsub.f32 %v141_v2, %v143_v1 }
 0x18f   :  { %383 = vrsqrt.f32 %v148_v3  ;;  %v147_v5 = vmax.f32 %v145_v4, 0.0 }
 0x191   :  { %v149_v6 = vadd.f32 1e-05, %v147_v5 }
 0x193   :  { %385 = vrsqrt.f32 %v149_v6 }
 0x19c   :  { %v384_v10 = vpop.eup %383 }
 0x19d   :  { %v158_v12 = vmul.f32 %v384_v10, %v157_v8 }
 0x19f   :  { %v160_v14 = vmul.f32 %v158_v12, %v152_v11 }
 0x1a0   :  { %v386_v15 = vpop.eup %385 }
 0x1a1   :  { %v166_v17 = vadd.f32 %v165_v13, %v160_v14  ;;  %v159_v18 = vmul.f32 %v386_v15, %v157_v8 }
 0x1a3   :  { %376 = vmatprep.mubr.f32.mxu1 %v166_v17  ;;  %v161_v20 = vmul.f32 %v159_v18, %v153_v16 }
 0x1a5   :  { %v167_v22 = vadd.f32 %v165_v13, %v161_v20 }
 0x1a7   :  { %377 = vmatmul.mubr.f32.vlgmr.msra.gmra.mxu1 %v167_v22 }
 0x267   :  { %v378_v23 = vpop.f32.mrf.mxu1 }
 0x268   :  { %v263_v24 = vadd.f32 %v378_v23, %v272_v19 }
 0x269   :  { %v257_v25 = vpop.f32.mrf.mxu1 }
 0x26a   :  { %267 = vst [vmem:[%s558_s5 + $0x8] sm:$0xff] %v263_v24  ;;  %v258_v21 = vadd.f32 %v272_v19, %v257_v25 }
 0x26c   :  { %266 = vst [vmem:[%s558_s5] sm:$0xff] %v258_v21 }

</bundles_post_ra>
